<compile_context>
chip_gen: v5e
topology: v5e:2x2
jax: 0.10.0
libtpu: 0.0.40
codegen_flags: <defaults>
</compile_context>

<pallas_src>
import jax
import jax.numpy as jnp
from jax import lax
from jax.experimental import pallas as pl
from jax.experimental.pallas import tpu as pltpu


def _round_up(x, m):
    return (x + m - 1) // m * m


# ---------------------------------------------------------------------------
# Kernels
# ---------------------------------------------------------------------------
def _probe_kernel_logits(x_ref, wt_ref, b_ref, logits_ref):
    """K-tiled matmul, accumulating directly into the resident logits block."""
    k = pl.program_id(1)
    nk = pl.num_programs(1)

    @pl.when(k == 0)
    def _():
        logits_ref[...] = jnp.zeros_like(logits_ref)

    x = x_ref[...]
    w = wt_ref[...].astype(x.dtype)          # bf16 in HBM -> upcast in VMEM (free)
    logits_ref[...] += jnp.dot(x, w, preferred_element_type=jnp.float32)

    @pl.when(k == nk - 1)
    def _():
        logits_ref[...] = logits_ref[...] + b_ref[...].astype(jnp.float32)


def _probe_kernel_ce(tgt_ref, x_ref, wt_ref, b_ref, logits_ref, lsum_ref, cnt_ref):
    """Matmul + bias + masked cross-entropy (ignore_index = -1) epilogue (f32)."""
    k = pl.program_id(1)
    nk = pl.num_programs(1)

    @pl.when(k == 0)
    def _():
        logits_ref[...] = jnp.zeros_like(logits_ref)

    x = x_ref[...]
    w = wt_ref[...].astype(x.dtype)
    logits_ref[...] += jnp.dot(x, w, preferred_element_type=jnp.float32)

    @pl.when(k == nk - 1)
    def _():
        logits = logits_ref[...] + b_ref[...].astype(jnp.float32)     # (tm, C) f32
        logits_ref[...] = logits

        tm, c = logits.shape
        tgt = tgt_ref[...]                                            # (tm, 1) int32
        col = lax.broadcasted_iota(jnp.int32, (tm, c), 1)

        m = jnp.max(logits, axis=-1, keepdims=True)
        lse = m + jnp.log(jnp.sum(jnp.exp(logits - m), axis=-1, keepdims=True))
        tgt_logit = jnp.max(jnp.where(col == tgt, logits, -1e30),
                            axis=-1, keepdims=True)
        valid = tgt != -1                                             # ignore_index
        per_row = jnp.where(valid, lse - tgt_logit, 0.0)              # stays f32

        lsum_ref[0, 0] = jnp.sum(per_row)
        cnt_ref[0, 0] = jnp.sum(valid.astype(jnp.float32))


# ---------------------------------------------------------------------------
# Wrapper around pallas_call
# ---------------------------------------------------------------------------
def _probe_forward(x_flat, wt, b, targets_flat, *, tk):
    """x_flat: (B, D) float, wt: (Dp, C) bf16/f32, b: (1, C) f32,
    targets_flat: (B,) int or None  ->  (logits (B, C) f32, loss scalar or None)."""
    B, D = x_flat.shape
    Dp, C = wt.shape

    # Batch tiling: one tile for small B (no padding, no copy); 256-row tiles
    # otherwise (keeps the weight re-stream small, still >=2 tiles for v7x's
    # two TensorCores once B > 256).
    if B <= 256:
        tm, Bp = B, B
    else:
        tm = 256
        Bp = _round_up(B, tm)
    nb, nk = Bp // tm, Dp // tk

    # Pad activations ONLY when actually required (ragged batch rows or D tail).
    x_in = x_flat
    if (Bp, Dp) != (B, D):
        x_in = jnp.zeros((Bp, Dp), x_flat.dtype).at[:B, :D].set(x_flat)

    x_spec = pl.BlockSpec((tm, tk), lambda i, k: (i, k))
    w_spec = pl.BlockSpec((tk, C), lambda i, k: (k, 0))     # compact class dim
    b_spec = pl.BlockSpec((1, C), lambda i, k: (0, 0))
    logits_spec = pl.BlockSpec((tm, C), lambda i, k: (i, 0))  # resident over k
    cparams = pltpu.CompilerParams(
        dimension_semantics=("parallel", "arbitrary"))

    if targets_flat is None:
        logits_p = pl.pallas_call(
            _probe_kernel_logits,
            out_shape=jax.ShapeDtypeStruct((Bp, C), jnp.float32),
            grid_spec=pltpu.PrefetchScalarGridSpec(
                num_scalar_prefetch=0,
                grid=(nb, nk),
                in_specs=[x_spec, w_spec, b_spec],
                out_specs=logits_spec),
            compiler_params=cparams,
        )(x_in, wt, b)
        logits = logits_p if Bp == B else logits_p[:B]
        return logits, None

    if Bp == B:
        tgt = targets_flat.astype(jnp.int32).reshape(Bp, 1)
    else:  # padded rows get target -1 -> ignored by the loss
        tgt = (jnp.full((Bp, 1), -1, jnp.int32)
               .at[:B, 0].set(targets_flat.astype(jnp.int32)))

    logits_p, lsum, cnt = pl.pallas_call(
        _probe_kernel_ce,
        out_shape=(
            jax.ShapeDtypeStruct((Bp, C), jnp.float32),
            jax.ShapeDtypeStruct((nb, 1), jnp.float32),
            jax.ShapeDtypeStruct((nb, 1), jnp.float32),
        ),
        grid_spec=pltpu.PrefetchScalarGridSpec(
            num_scalar_prefetch=0,
            grid=(nb, nk),
            in_specs=[
                pl.BlockSpec((tm, 1), lambda i, k: (i, 0)),  # targets
                x_spec, w_spec, b_spec,
            ],
            out_specs=[
                logits_spec,
                pl.BlockSpec((1, 1), lambda i, k: (i, 0),
                             memory_space=pltpu.MemorySpace.SMEM),
                pl.BlockSpec((1, 1), lambda i, k: (i, 0),
                             memory_space=pltpu.MemorySpace.SMEM),
            ]),
        compiler_params=cparams,
    )(tgt, x_in, wt, b)

    logits = logits_p if Bp == B else logits_p[:B]
    # NOTE: if every target is ignored this is 0/0 = NaN, matching
    # torch.nn.functional.cross_entropy(ignore_index=-1) semantics.
    loss = jnp.sum(lsum) / jnp.sum(cnt)
    return logits, loss


# ---------------------------------------------------------------------------
# Probe wrapper (mirrors the PyTorch nn.Module)
# ---------------------------------------------------------------------------
class Probe:
    def __init__(self, n_classes, input_dim, key, tk_max=2048,
                 param_dtype=jnp.bfloat16):
        self.n_classes = int(n_classes)
        self.shape = tuple(int(s) for s in input_dim)
        self.input_dim = 1
        for s in self.shape:
            self.input_dim *= s
        D, C = self.input_dim, self.n_classes

        kw, kb = jax.random.split(key)
        # deterministic init ~ nn.Linear default (uniform in +-1/sqrt(fan_in))
        bound = 1.0 / (D ** 0.5)
        self.W = jax.random.uniform(kw, (C, D), jnp.float32, -bound, bound)
        self.b = jax.random.uniform(kb, (C,), jnp.float32, -bound, bound)

        # K geometry: Dp = round_up(D, 128); tk = largest 128-multiple divisor of
        # Dp that is <= tk_max (so Dp needs no extra K padding and nk is minimal).
        self.Dp = _round_up(D, 128)
        m = self.Dp // 128
        d_max = max(1, min(m, tk_max // 128))
        d = next(dd for dd in range(d_max, 0, -1) if m % dd == 0)
        self.tk = 128 * d

        # Kernel-side parameters prepared ONCE: transpose, zero-pad only along D,
        # keep the class dim compact in HBM, store in bf16 (param_dtype).
        self.Wt = (jnp.zeros((self.Dp, C), jnp.float32)
                   .at[:D, :].set(jnp.transpose(self.W))).astype(param_dtype)
        self.b2 = self.b.reshape(1, C).astype(jnp.float32)

    def forward(self, x, targets=None):
        x_flat = x.reshape(x.shape[0], -1)                  # x.view(x.size(0), -1)
        tgt = targets.reshape(-1) if targets is not None else None
        return _probe_forward(x_flat, self.Wt, self.b2, tgt, tk=self.tk)


if __name__ == "__main__":
    key = jax.random.PRNGKey(0)
    k_x, k_t, k_p = jax.random.split(key, 3)

    # Small shapes consistent with the module: input_dim = wpe.weight shape
    # = (seq, n_embd) with n_embd = 2**4 * 3 = 48 in the reference config.
    batch, seq, hidden = 2, 8, 48
    n_classes = 8

    probe = Probe(n_classes, (seq, hidden), k_p)

    x = jax.random.normal(k_x, (batch, seq, hidden), jnp.float32)
    targets = jax.random.randint(k_t, (batch,), 0, n_classes, jnp.int32)

    logits, loss = probe.forward(x, targets)
    logits = jax.block_until_ready(logits)
    loss = jax.block_until_ready(loss)

    # targets=None path (loss must be None, logits identical)
    logits_nl, loss_nl = probe.forward(x, None)
    logits_nl = jax.block_until_ready(logits_nl)
    assert loss_nl is None

    # ignore_index=-1 path
    targets_ig = targets.at[0].set(-1)
    _, loss_ig = probe.forward(x, targets_ig)
    loss_ig = jax.block_until_ready(loss_ig)

    # Reference (plain JAX, full f32 precision) using the bf16-quantized weights
    # the kernel actually sees.
    D = seq * hidden
    W_eff = probe.Wt[:D, :].astype(jnp.float32)              # (D, C)
    ref_logits = jnp.dot(x.reshape(batch, -1), W_eff,
                         precision=lax.Precision.HIGHEST) + probe.b
    ref_lse = jax.scipy.special.logsumexp(ref_logits, axis=-1)
    ref_loss = jnp.mean(ref_lse - ref_logits[jnp.arange(batch), targets])
    valid_ig = targets_ig != -1
    ref_loss_ig = (jnp.sum(jnp.where(
        valid_ig,
        ref_lse - ref_logits[jnp.arange(batch), jnp.maximum(targets_ig, 0)],
        0.0)) / jnp.sum(valid_ig))

    assert logits.shape == (batch, n_classes)
    assert jnp.allclose(logits, ref_logits, atol=5e-3, rtol=5e-3)
    assert jnp.allclose(logits_nl, ref_logits, atol=5e-3, rtol=5e-3)
    assert jnp.allclose(loss, ref_loss, atol=5e-3, rtol=5e-3)
    assert jnp.allclose(loss_ig, ref_loss_ig, atol=5e-3, rtol=5e-3)

    print("KERNEL_OK")
</pallas_src>

<mosaic_0001>
module attributes {stable_mosaic.version = 11 : i64} {
  func.func @_probe_kernel_ce(%arg0: i32, %arg1: i32, %arg2: memref<2x1xi32, #tpu.memory_space<vmem>>, %arg3: memref<2x384xf32, #tpu.memory_space<vmem>>, %arg4: memref<384x8xbf16, #tpu.memory_space<vmem>>, %arg5: memref<1x8xf32, #tpu.memory_space<vmem>>, %arg6: memref<2x8xf32, #tpu.memory_space<vmem>>, %arg7: memref<1x1xf32, #tpu.memory_space<smem>>, %arg8: memref<1x1xf32, #tpu.memory_space<smem>>) attributes {dimension_semantics = [#tpu.dimension_semantics<parallel>, #tpu.dimension_semantics<arbitrary>], iteration_bounds = array<i64: 1, 1>, scalar_prefetch = 0 : i64, scratch_operands = 0 : i64, tpu.core_type = #tpu.core_type<tc>, window_params = [{transform_indices = @transform_0, window_bounds = array<i64: 2, 1>}, {transform_indices = @transform_1, window_bounds = array<i64: 2, 384>}, {transform_indices = @transform_2, window_bounds = array<i64: 384, 8>}, {pipeline_mode = #tpu.pipeline_mode<synchronous>, transform_indices = @transform_3, window_bounds = array<i64: 1, 8>}, {transform_indices = @transform_4, window_bounds = array<i64: 2, 8>}, {transform_indices = @transform_5, window_bounds = array<i64: 1, 1>}, {transform_indices = @transform_6, window_bounds = array<i64: 1, 1>}]} {
    %c0_i32 = arith.constant 0 : i32
    %0 = arith.cmpi eq, %arg1, %c0_i32 : i32
    %1 = arith.extui %0 : i1 to i32
    %c0_i32_0 = arith.constant 0 : i32
    %2 = arith.cmpi ne, %1, %c0_i32_0 : i32
    scf.if %2 {
      %cst_10 = arith.constant 0.000000e+00 : f32
      %13 = vector.broadcast %cst_10 : f32 to vector<2x8xf32>
      %c0_11 = arith.constant 0 : index
      %c0_12 = arith.constant 0 : index
      %14 = vector.load %arg6[%c0_11, %c0_12] : memref<2x8xf32, #tpu.memory_space<vmem>>, vector<2x8xf32>
      tpu.vector_store %arg6[%c0_11, %c0_12], %13 {strides = array<i32>} : memref<2x8xf32, #tpu.memory_space<vmem>>, vector<2x8xf32>,
    } else {
    }
    %c0 = arith.constant 0 : index
    %c0_1 = arith.constant 0 : index
    %3 = vector.load %arg3[%c0, %c0_1] : memref<2x384xf32, #tpu.memory_space<vmem>>, vector<2x384xf32>
    %c0_2 = arith.constant 0 : index
    %c0_3 = arith.constant 0 : index
    %4 = vector.load %arg4[%c0_2, %c0_3] : memref<384x8xbf16, #tpu.memory_space<vmem>>, vector<384x8xbf16>
    %5 = arith.extf %4 : vector<384x8xbf16> to vector<384x8xf32>
    %c0_4 = arith.constant 0 : index
    %c0_5 = arith.constant 0 : index
    %6 = vector.load %arg6[%c0_4, %c0_5] : memref<2x8xf32, #tpu.memory_space<vmem>>, vector<2x8xf32>
    %cst = arith.constant dense<0.000000e+00> : vector<2x8xf32>
    %7 = tpu.matmul %3, %5, %cst {dimension_numbers = #tpu.dot_dimension_numbers<[1], [0], [0], [1], [0, 0, 1, 1], [], []>} : vector<2x384xf32>, vector<384x8xf32>, vector<2x8xf32> -> vector<2x8xf32>
    %8 = arith.addf %6, %7 : vector<2x8xf32>
    %c0_6 = arith.constant 0 : index
    %c0_7 = arith.constant 0 : index
    %9 = vector.load %arg6[%c0_6, %c0_7] : memref<2x8xf32, #tpu.memory_space<vmem>>, vector<2x8xf32>
    tpu.vector_store %arg6[%c0_6, %c0_7], %8 {strides = array<i32>} : memref<2x8xf32, #tpu.memory_space<vmem>>, vector<2x8xf32>,
    %c0_i32_8 = arith.constant 0 : i32
    %10 = arith.cmpi eq, %arg1, %c0_i32_8 : i32
    %11 = arith.extui %10 : i1 to i32
    %c0_i32_9 = arith.constant 0 : i32
    %12 = arith.cmpi ne, %11, %c0_i32_9 : i32
    scf.if %12 {
      %c0_10 = arith.constant 0 : index
      %c0_11 = arith.constant 0 : index
      %13 = vector.load %arg6[%c0_10, %c0_11] : memref<2x8xf32, #tpu.memory_space<vmem>>, vector<2x8xf32>
      %c0_12 = arith.constant 0 : index
      %c0_13 = arith.constant 0 : index
      %14 = vector.load %arg5[%c0_12, %c0_13] : memref<1x8xf32, #tpu.memory_space<vmem>>, vector<1x8xf32>
      %15 = vector.broadcast %14 : vector<1x8xf32> to vector<2x8xf32>
      %16 = arith.addf %13, %15 : vector<2x8xf32>
      %c0_14 = arith.constant 0 : index
      %c0_15 = arith.constant 0 : index
      %17 = vector.load %arg6[%c0_14, %c0_15] : memref<2x8xf32, #tpu.memory_space<vmem>>, vector<2x8xf32>
      tpu.vector_store %arg6[%c0_14, %c0_15], %16 {strides = array<i32>} : memref<2x8xf32, #tpu.memory_space<vmem>>, vector<2x8xf32>,
      %c0_16 = arith.constant 0 : index
      %c0_17 = arith.constant 0 : index
      %18 = vector.load %arg2[%c0_16, %c0_17] : memref<2x1xi32, #tpu.memory_space<vmem>>, vector<2x1xi32>
      %19 = tpu.iota {dimensions = array<i32: 1>} : vector<2x8xi32>
      %cst_18 = arith.constant dense<0xFF800000> : vector<2xf32>
      %20 = vector.multi_reduction <maximumf>, %16, %cst_18 [1] : vector<2x8xf32> to vector<2xf32>
      %21 = vector.shape_cast %20 : vector<2xf32> to vector<2x1xf32>
      %22 = vector.broadcast %21 : vector<2x1xf32> to vector<2x8xf32>
      %23 = arith.subf %16, %22 : vector<2x8xf32>
      %24 = math.exp %23 : vector<2x8xf32>
      %cst_19 = arith.constant dense<0.000000e+00> : vector<2xf32>
      %25 = vector.multi_reduction <add>, %24, %cst_19 [1] : vector<2x8xf32> to vector<2xf32>
      %26 = vector.shape_cast %25 : vector<2xf32> to vector<2x1xf32>
      %27 = math.log %26 : vector<2x1xf32>
      %28 = arith.addf %21, %27 : vector<2x1xf32>
      %29 = vector.broadcast %18 : vector<2x1xi32> to vector<2x8xi32>
      %30 = arith.cmpi eq, %19, %29 : vector<2x8xi32>
      %cst_20 = arith.constant -1.000000e+30 : f32
      %31 = vector.broadcast %cst_20 : f32 to vector<2x8xf32>
      %32 = arith.select %30, %16, %31 : vector<2x8xi1>, vector<2x8xf32>
      %cst_21 = arith.constant dense<0xFF800000> : vector<2xf32>
      %33 = vector.multi_reduction <maximumf>, %32, %cst_21 [1] : vector<2x8xf32> to vector<2xf32>
      %34 = vector.shape_cast %33 : vector<2xf32> to vector<2x1xf32>
      %c-1_i32 = arith.constant -1 : i32
      %35 = vector.broadcast %c-1_i32 : i32 to vector<2x1xi32>
      %36 = arith.cmpi ne, %18, %35 : vector<2x1xi32>
      %37 = arith.subf %28, %34 : vector<2x1xf32>
      %cst_22 = arith.constant 0.000000e+00 : f32
      %38 = vector.broadcast %cst_22 : f32 to vector<2x1xf32>
      %39 = arith.select %36, %37, %38 : vector<2x1xi1>, vector<2x1xf32>
      %40 = vector.shape_cast %39 : vector<2x1xf32> to vector<1x2x1xf32>
      %cst_23 = arith.constant dense<0.000000e+00> : vector<1xf32>
      %41 = vector.multi_reduction <add>, %40, %cst_23 [1, 2] : vector<1x2x1xf32> to vector<1xf32>
      %42 = vector.shape_cast %41 : vector<1xf32> to vector<1x1x1xf32>
      %43 = vector.extract %42[0, 0, 0] : f32 from vector<1x1x1xf32>
      %c0_24 = arith.constant 0 : index
      %c0_25 = arith.constant 0 : index
      %44 = memref.load %arg7[%c0_24, %c0_25] : memref<1x1xf32, #tpu.memory_space<smem>>
      memref.store %43, %arg7[%c0_24, %c0_25] : memref<1x1xf32, #tpu.memory_space<smem>>
      %45 = arith.extui %36 : vector<2x1xi1> to vector<2x1xi32>
      %46 = arith.sitofp %45 : vector<2x1xi32> to vector<2x1xf32>
      %47 = vector.shape_cast %46 : vector<2x1xf32> to vector<1x2x1xf32>
      %cst_26 = arith.constant dense<0.000000e+00> : vector<1xf32>
      %48 = vector.multi_reduction <add>, %47, %cst_26 [1, 2] : vector<1x2x1xf32> to vector<1xf32>
      %49 = vector.shape_cast %48 : vector<1xf32> to vector<1x1x1xf32>
      %50 = vector.extract %49[0, 0, 0] : f32 from vector<1x1x1xf32>
      %c0_27 = arith.constant 0 : index
      %c0_28 = arith.constant 0 : index
      %51 = memref.load %arg8[%c0_27, %c0_28] : memref<1x1xf32, #tpu.memory_space<smem>>
      memref.store %50, %arg8[%c0_27, %c0_28] : memref<1x1xf32, #tpu.memory_space<smem>>
    } else {
    }
    return
  }
  func.func @transform_0(%arg0: i32, %arg1: i32) -> (i32, i32) {
    %c0_i32 = arith.constant 0 : i32
    %c0_i32_0 = arith.constant 0 : i32
    return %arg0, %c0_i32 : i32, i32
  }
  func.func @transform_1(%arg0: i32, %arg1: i32) -> (i32, i32) {
    %c0_i32 = arith.constant 0 : i32
    return %arg0, %arg1 : i32, i32
  }
  func.func @transform_2(%arg0: i32, %arg1: i32) -> (i32, i32) {
    %c0_i32 = arith.constant 0 : i32
    %c0_i32_0 = arith.constant 0 : i32
    return %arg1, %c0_i32 : i32, i32
  }
  func.func @transform_3(%arg0: i32, %arg1: i32) -> (i32, i32) {
    %c0_i32 = arith.constant 0 : i32
    %c0_i32_0 = arith.constant 0 : i32
    %c0_i32_1 = arith.constant 0 : i32
    return %c0_i32, %c0_i32_0 : i32, i32
  }
  func.func @transform_4(%arg0: i32, %arg1: i32) -> (i32, i32) {
    %c0_i32 = arith.constant 0 : i32
    %c0_i32_0 = arith.constant 0 : i32
    return %arg0, %c0_i32 : i32, i32
  }
  func.func @transform_5(%arg0: i32, %arg1: i32) -> (i32, i32) {
    %c0_i32 = arith.constant 0 : i32
    %c0_i32_0 = arith.constant 0 : i32
    return %arg0, %c0_i32 : i32, i32
  }
  func.func @transform_6(%arg0: i32, %arg1: i32) -> (i32, i32) {
    %c0_i32 = arith.constant 0 : i32
    %c0_i32_0 = arith.constant 0 : i32
    return %arg0, %c0_i32 : i32, i32
  }
}

</mosaic_0001>

<bundles_post_ra>
// kernel: tpu_custom_call.1
= control target key start
LH: loop header
LB: loop body
LE: loop exit
PB: predicated region body
PF: predicated region fallthrough
CT: control target
= control target key end

     0   :  { %12 = vsyncpa [#allocation3], 0  ;;  %s631_s0 = inlined_call_operand.vmem [shape: s32[2,1], index: 0, kind: input, shape index: {}]   ;;  %s632_s1 = inlined_call_operand.vmem [shape: f32[2,384], index: 1, kind: input, shape index: {}]   ;;  %s633_s2 = inlined_call_operand.vmem [shape: bf16[384,8], index: 2, kind: input, shape index: {}]   ;;  %s634_s3 = inlined_call_operand.vmem [shape: f32[1,8], index: 3, kind: input, shape index: {}]   ;;  %s635_s4 = inlined_call_operand.hbm [shape: f32[2,8], index: 4, kind: output, shape index: {0}]   ;;  %s636_s5 = inlined_call_operand.hbm [shape: f32[1,1], index: 5, kind: output, shape index: {1}]   ;;  %s637_s6 = inlined_call_operand.hbm [shape: f32[1,1], index: 6, kind: output, shape index: {2}]  }
   0x1   :  { %13 = vsyncpa [#allocation4], 0  ;;  %v425_v0 = vld [vmem:[%s633_s2 + $0xb8] sm:$0xff]   ;;  %v424_v7 = vld [vmem:[%s633_s2 + $0xb0] sm:$0xff]  }
   0x2   :  { %v409_v1 = vld [vmem:[%s633_s2 + $0x38] sm:$0xff]   ;;  %v402_v3 = vunpack.c.h.bf16 %v425_v0  ;;  %v401_v4 = vunpack.c.l.bf16 %v425_v0  ;;  %v408_v8 = vld [vmem:[%s633_s2 + $0x30] sm:$0xff]   ;;  %v398_v12 = vunpack.c.h.bf16 %v424_v7  ;;  %v423_v15 = vld [vmem:[%s633_s2 + $0xa8] sm:$0xff]   ;;  %v397_v17 = vunpack.c.l.bf16 %v424_v7 }
   0x3   :  { %v417_v2 = vld [vmem:[%s633_s2 + $0x78] sm:$0xff]   ;;  %v338_v5 = vunpack.c.h.bf16 %v409_v1  ;;  %v416_v9 = vld [vmem:[%s633_s2 + $0x70] sm:$0xff]   ;;  %v337_v10 = vunpack.c.l.bf16 %v409_v1  ;;  %v334_v13 = vunpack.c.h.bf16 %v408_v8  ;;  %v407_v16 = vld [vmem:[%s633_s2 + $0x28] sm:$0xff]   ;;  %v333_v18 = vunpack.c.l.bf16 %v408_v8 }
   0x4   :  { %v370_v6 = vunpack.c.h.bf16 %v417_v2  ;;  %v369_v11 = vunpack.c.l.bf16 %v417_v2  ;;  %175 = vmatpush.msra.mxu2 %v402_v3  ;;  %v366_v14 = vunpack.c.h.bf16 %v416_v9  ;;  %v415_v19 = vld [vmem:[%s633_s2 + $0x68] sm:$0xff]   ;;  %v365_v20 = vunpack.c.l.bf16 %v416_v9  ;;  %v29_v23 = vld [vmem:[%s632_s1] sm:$0x3f] }
   0x5   :  { %135 = vmatpush.msra.mxu0 %v338_v5  ;;  %v394_v21 = vunpack.c.h.bf16 %v423_v15  ;;  %v330_v22 = vunpack.c.h.bf16 %v407_v16  ;;  %v362_v24 = vunpack.c.h.bf16 %v415_v19  ;;  %v422_v25 = vld [vmem:[%s633_s2 + $0xa0] sm:$0xff]   ;;  %128 = vst [vmem:[#allocation1] ss:$4 sm:$0xff] %v29_v23  ;;  %v393_v27 = vunpack.c.l.bf16 %v423_v15 }
   0x6   :  { %155 = vmatpush.msra.mxu1 %v370_v6  ;;  %176 = vmatpush.msra.mxu2 %v401_v4  ;;  %v406_v26 = vld [vmem:[%s633_s2 + $0x20] sm:$0xff]   ;;  %v329_v28 = vunpack.c.l.bf16 %v407_v16 }
   0x7   :  { %136 = vmatpush.msra.mxu0 %v337_v10  ;;  %v414_v29 = vld [vmem:[%s633_s2 + $0x60] sm:$0xff]  }
   0x8   :  { %156 = vmatpush.msra.mxu1 %v369_v11  ;;  %177 = vmatpush.msra.mxu2 %v398_v12 }
   0x9   :  { %137 = vmatpush.msra.mxu0 %v334_v13 }
   0xa   :  { %157 = vmatpush.msra.mxu1 %v366_v14  ;;  %178 = vmatpush.msra.mxu2 %v397_v17 }
   0xb   :  { %138 = vmatpush.msra.mxu0 %v333_v18 }
   0xc   :  { %14 = vsyncpa [#allocation7], 0  ;;  %158 = vmatpush.msra.mxu1 %v365_v20  ;;  %v361_v30 = vunpack.c.l.bf16 %v415_v19  ;;  %179 = vmatpush.msra.mxu2 %v394_v21  ;;  %v390_v31 = vunpack.c.h.bf16 %v422_v25  ;;  %v326_v32 = vunpack.c.h.bf16 %v406_v26  ;;  %v358_v33 = vunpack.c.h.bf16 %v414_v29  ;;  %v421_v34 = vld [vmem:[%s633_s2 + $0x98] sm:$0xff]   ;;  %v420_v43 = vld [vmem:[%s633_s2 + $0x90] sm:$0xff]   ;;  %s268_s26 = sshll.u32 %s635_s4, 4  ;;  %s277_s28 = sshll.u32 %s636_s5, 4  ;;  %s269_s26 = int_to_ptr.hbm [resolvable:$true] %s268_s26  ;;  %s278_s28 = int_to_ptr.hbm [resolvable:$true] %s277_s28 }
   0xd   :  { %139 = vmatpush.msra.mxu0 %v330_v22  ;;  %v405_v35 = vld [vmem:[%s633_s2 + $0x18] sm:$0xff]   ;;  %v389_v36 = vunpack.c.l.bf16 %v422_v25  ;;  %v325_v37 = vunpack.c.l.bf16 %v406_v26  ;;  %v357_v39 = vunpack.c.l.bf16 %v414_v29  ;;  %v386_v40 = vunpack.c.h.bf16 %v421_v34  ;;  %v404_v44 = vld [vmem:[%s633_s2 + $0x10] sm:$0xff]   ;;  %v419_v52 = vld [vmem:[%s633_s2 + $0x88] sm:$0xff]   ;;  %s498_s30 = smov [#allocation5]   ;;  %s286_s9 = sshll.u32 %s637_s6, 4  ;;  %s287_s9 = int_to_ptr.hbm [resolvable:$true] %s286_s9 }
   0xe   :  { %159 = vmatpush.msra.mxu1 %v362_v24  ;;  %180 = vmatpush.msra.mxu2 %v393_v27  ;;  %v413_v38 = vld [vmem:[%s633_s2 + $0x58] sm:$0xff]   ;;  %v322_v41 = vunpack.c.h.bf16 %v405_v35  ;;  %v385_v45 = vunpack.c.l.bf16 %v421_v34  ;;  %v321_v46 = vunpack.c.l.bf16 %v405_v35  ;;  %v412_v47 = vld [vmem:[%s633_s2 + $0x50] sm:$0xff]   ;;  %v382_v49 = vunpack.c.h.bf16 %v420_v43  ;;  %v403_v53 = vld [vmem:[%s633_s2 + $0x8] sm:$0xff]   ;;  %s499_s11 = smov [#allocation6]  }
   0xf   :  { %140 = vmatpush.msra.mxu0 %v329_v28  ;;  %v354_v42 = vunpack.c.h.bf16 %v413_v38  ;;  %v353_v48 = vunpack.c.l.bf16 %v413_v38  ;;  %v318_v50 = vunpack.c.h.bf16 %v404_v44  ;;  %v350_v51 = vunpack.c.h.bf16 %v412_v47  ;;  %v411_v56 = vld [vmem:[%s633_s2 + $0x48] sm:$0xff]   ;;  %v418_v61 = vld [vmem:[%s633_s2 + $0x80] sm:$0xff]   ;;  %v131_v9 = vld.sshfl [vmem:[#allocation1 + $0x10] sm:$0xff pattern:$0x73625140] }
  0x10   :  { %160 = vmatpush.msra.mxu1 %v361_v30  ;;  %181 = vmatpush.msra.mxu2 %v390_v31  ;;  %v381_v54 = vunpack.c.l.bf16 %v420_v43  ;;  %v317_v55 = vunpack.c.l.bf16 %v404_v44  ;;  %v349_v57 = vunpack.c.l.bf16 %v412_v47  ;;  %v378_v58 = vunpack.c.h.bf16 %v419_v52  ;;  %v308_v62 = vld [vmem:[%s633_s2] sm:$0xff]   ;;  %v130_v11 = vld.sshfl [vmem:[#allocation1 + $0x8] sm:$0xff pattern:$0x73625140] }
  0x11   :  { %141 = vmatpush.msra.mxu0 %v326_v32  ;;  %v314_v59 = vunpack.c.h.bf16 %v403_v53  ;;  %v346_v60 = vunpack.c.h.bf16 %v411_v56  ;;  %v377_v63 = vunpack.c.l.bf16 %v419_v52  ;;  %v313_v0 = vunpack.c.l.bf16 %v403_v53  ;;  %v410_v1 = vld [vmem:[%s633_s2 + $0x40] sm:$0xff]  }
  0x12   :  { %161 = vmatpush.msra.mxu1 %v358_v33  ;;  %182 = vmatpush.msra.mxu2 %v389_v36  ;;  %v345_v2 = vunpack.c.l.bf16 %v411_v56  ;;  %v374_v3 = vunpack.c.h.bf16 %v418_v61  ;;  %v310_v4 = vunpack.c.h.bf16 %v308_v62  ;;  %v342_v5 = vunpack.c.h.bf16 %v410_v1  ;;  %v129_v10 = vld.sshfl [vmem:[#allocation1] sm:$0xff pattern:$0x73625140] }
  0x13   :  { %142 = vmatpush.msra.mxu0 %v325_v37  ;;  %v373_v6 = vunpack.c.l.bf16 %v418_v61  ;;  %v309_v7 = vunpack.c.l.bf16 %v308_v62  ;;  %v341_v8 = vunpack.c.l.bf16 %v410_v1  ;;  %vm27_vm0 = vcmask 58368   ;;  %v436_v21 = vld [vmem:[%s634_s3] ss:$0 sm:$0xff] }
  0x14   :  { %162 = vmatpush.msra.mxu1 %v357_v39  ;;  %183 = vmatpush.msra.mxu2 %v386_v40  ;;  %v495_v12 = vmov 0.0   ;;  %v496_v13 = vmov 0   ;;  %v208_v25 = vld [vmem:[%s631_s0] sm:$0x3]  ;;  %v209_v31 = vlaneseq  ;;  %vm234_vm3 = vcmask 1024   ;;  %s497_s0 = smov [#allocation2]  }
  0x15   :  { %143 = vmatpush.msra.mxu0 %v322_v41  ;;  %28 = vst.msk [vmem:[#allocation2] sm:$0x3] %vm27_vm0, %v495_v12  ;;  %435 = vset.pattern.permute.xlu0 %v496_v13  ;;  %vm231_vm2 = vcmp.ne.s32.totalorder %v208_v25, 4294967295  ;;  %s266_s3 = sshll.u32 %s497_s0, 4  ;;  %s267_s3 = int_to_ptr.vmem [resolvable:$true] %s266_s3 }
  0x16   :  { %163 = vmatpush.msra.mxu1 %v354_v42  ;;  %184 = vmatpush.msra.mxu2 %v385_v45  ;;  %v210_v32 = vand.u32 127, %v209_v31  ;;  %v306_v44 = vsel %vm231_vm2, 1.0, %v495_v12 }
  0x17   :  { %144 = vmatpush.msra.mxu0 %v321_v46  ;;  %v249_v45 = vsel %vm234_vm3, %v306_v44, 0.0 }
  0x18   :  { %164 = vmatpush.msra.mxu1 %v353_v48  ;;  %185 = vmatpush.msra.mxu2 %v382_v49 }
  0x19   :  { %145 = vmatpush.msra.mxu0 %v318_v50 }
  0x1a   :  { %165 = vmatpush.msra.mxu1 %v350_v51  ;;  %186 = vmatpush.msra.mxu2 %v381_v54 }
  0x1b   :  { %146 = vmatpush.msra.mxu0 %v317_v55 }
  0x1c   :  { %166 = vmatpush.msra.mxu1 %v349_v57  ;;  %187 = vmatpush.msra.mxu2 %v378_v58  ;;  %v126_v17 = vld [vmem:[#allocation2] sm:$0x3] }
  0x1d   :  { %147 = vmatpush.msra.mxu0 %v314_v59 }
  0x1e   :  { %167 = vmatpush.msra.mxu1 %v346_v60  ;;  %188 = vmatpush.msra.mxu2 %v377_v63 }
  0x1f   :  { %148 = vmatpush.msra.mxu0 %v313_v0 }
  0x20   :  { %168 = vmatpush.msra.mxu1 %v345_v2  ;;  %189 = vmatpush.msra.mxu2 %v374_v3 }
  0x21   :  { %149 = vmatpush.msra.mxu0 %v310_v4 }
  0x22   :  { %169 = vmatpush.msra.mxu1 %v342_v5  ;;  %190 = vmatpush.msra.mxu2 %v373_v6 }
  0x23   :  { %150 = vmatpush.msra.mxu0 %v309_v7  ;;  %191 = vmatmul.f32.vlgmr.msra.gmra.mxu2 %v131_v9 }
  0x24   :  { %170 = vmatpush.msra.mxu1 %v341_v8  ;;  %151 = vmatmul.f32.vlgmr.msra.gmra.mxu0 %v129_v10 }
  0x25   :  { %171 = vmatmul.f32.vlgmr.msra.gmra.mxu1 %v130_v11 }
  0xa1   :  { %v152_v14 = vpop.f32.mrf.mxu0 }
  0xa2   :  { %v172_v15 = vpop.f32.mrf.mxu1 }
  0xa3   :  { %v173_v16 = vadd.f32 %v172_v15, %v152_v14 }
  0xa6   :  { %v192_v18 = vpop.f32.mrf.mxu2 }
  0xa7   :  { %v193_v19 = vadd.f32 %v192_v18, %v173_v16 }
  0xa9   :  { %v195_v20 = vadd.f32 %v193_v19, %v126_v17 }
  0xab   :  { %197 = vst.msk [vmem:[#allocation2] sm:$0x3] %vm27_vm0, %v195_v20 }
  0xb2   :  { %v201_v22 = vld [vmem:[#allocation2] sm:$0x3] }
  0xb3   :  { %v206_v23 = vadd.f32 %v436_v21, %v201_v22 }
  0xb5   :  { %v211_v24 = vsel %vm27_vm0, %v206_v23, -inf  ;;  %207 = vst.msk [vmem:[#allocation2] sm:$0x3] %vm27_vm0, %v206_v23 }
  0xb6   :  { %212 = vmax.xlane.f32.xlu0 %v211_v24  ;;  %271 = dma.vmem_to_hbm [thread:$0]  %s267_s3, 32, %s269_s26, [#allocation3]  }
  0xca   :  { %224 = vperm.xlu0 %435, %v208_v25  }
 0x129   :  { %v213_v26 = vpop.xlane.xlu0 %212 }
 0x12a   :  { %v214_v27 = vsub.f32 %v206_v23, %v213_v26 }
 0x12c   :  { %v215_v28 = vmul.f32 1.442695, %v214_v27 }
 0x12e   :  { %437 = vpow2.f32 %v215_v28 }
 0x134   :  { %v438_v29 = vpop.eup %437 }
 0x135   :  { %v217_v30 = vsel %vm27_vm0, %v438_v29, 0.0 }
 0x136   :  { %218 = vadd.xlane.f32.xlu1 %v217_v30 }
 0x13c   :  { %v225_v33 = vpop.permute.xlu0 %224 }
 0x13d   :  { %vm226_vm1 = vcmp.eq.s32.totalorder %v210_v32, %v225_v33 }
 0x13e   :  { %v227_v34 = vsel %vm226_vm1, %v206_v23, -1e+30 }
 0x13f   :  { %v228_v35 = vsel %vm27_vm0, %v227_v34, -inf }
 0x140   :  { %229 = vmax.xlane.f32.xlu1 %v228_v35 }
 0x1a9   :  { %v219_v36 = vpop.xlane.xlu1 %218 }
 0x1aa   :  { %439 = vlog2.f32 %v219_v36 }
 0x1b0   :  { %v440_v37 = vpop.eup %439 }
 0x1b1   :  { %v221_v38 = vmul.f32 0.6931472, %v440_v37 }
 0x1b3   :  { %v222_v39 = vadd.f32 %v221_v38, %v213_v26  ;;  %v230_v40 = vpop.xlane.xlu1 %229 }
 0x1b5   :  { %v232_v41 = vsub.f32 %v222_v39, %v230_v40 }
 0x1b7   :  { %v233_v42 = vsel %vm231_vm2, %v232_v41, 0.0 }
 0x1b8   :  { %v235_v43 = vsel %vm234_vm3, %v233_v42, 0.0 }
 0x1b9   :  { %236 = vadd.xlane.f32.xlu2 %v235_v43 }
 0x1c1   :  { %250 = vadd.xlane.f32.xlu2 %v249_v45 }
 0x22c   :  { %v237_v46 = vpop.xlane.xlu2 %236 }
 0x22d   :  { %v238_v47 = vrot.slane %v237_v46, 4 }
 0x22f   :  { %v239_v48 = vadd.f32 %v238_v47, %v237_v46 }
 0x231   :  { %v240_v49 = vrot.slane %v239_v48, 2 }
 0x233   :  { %v241_v50 = vadd.f32 %v240_v49, %v239_v48 }
 0x234   :  { %v251_v51 = vpop.xlane.xlu2 %250 }
 0x235   :  { %v252_v52 = vrot.slane %v251_v51, 4  ;;  %v242_v53 = vrot.slane %v241_v50, 1 }
 0x237   :  { %v253_v54 = vadd.f32 %v252_v52, %v251_v51  ;;  %v243_v55 = vadd.f32 %v242_v53, %v241_v50 }
 0x239   :  { %v254_v56 = vrot.slane %v253_v54, 2  ;;  %426 = vpush %v243_v55 }
 0x23b   :  { %v255_v57 = vadd.f32 %v254_v56, %v253_v54 }
 0x23d   :  { %v256_v58 = vrot.slane %v255_v57, 1 }
 0x23f   :  { %v257_v59 = vadd.f32 %v256_v58, %v255_v57 }
 0x241   :  { %428 = vpush %v257_v59 }
 0x26a   :  { %s427_s29 = spop %426 }
 0x26b   :  { %246 = sst [smem:[#allocation5]] %s427_s29 }
 0x26c   :  { %280 = dma.smem_to_hbm %s498_s30, 16, %s278_s28, [#allocation4]  }
 0x272   :  { %s429_s10 = spop %428 }
 0x273   :  { %260 = sst [smem:[#allocation6]] %s429_s10 }
 0x274   :  { %289 = dma.smem_to_hbm %s499_s11, 16, %s287_s9, [#allocation7]  }
 0x275   :  { %489 = dma.done.wait [#allocation3], 32  }
 0x276   :  { %490 = vsyncadd [#allocation3], 4294967264 }
 0x277   :  { %491 = dma.done.wait [#allocation4], 16  }
 0x278   :  { %492 = vsyncadd [#allocation4], 4294967280 }
 0x279   :  { %493 = dma.done.wait [#allocation7], 16  }
 0x27a   :  { %494 = vsyncadd [#allocation7], 4294967280 }
 0x27b   :  { %302 = sfence }
 0x27c   :  { %303 = vsyncpa [#allocation3], 1 }
 0x27d   :  { %304 = vsyncpa [#allocation4], 1 }
 0x27e   :  { %305 = vsyncpa [#allocation7], 1 }

</bundles_post_ra>
